<compile_context>
chip_gen: v7x
topology: tpu7x:2x2x1
jax: 0.10.0
libtpu: 0.0.40
codegen_flags: <defaults>
</compile_context>

<pallas_src>
import functools
import math

import jax
import jax.numpy as jnp
from jax import lax
from jax.experimental import pallas as pl
from jax.experimental.pallas import tpu as pltpu


# ----------------------------- Pallas kernel ------------------------------------------

def _mha_kernel(q_ref, k_ref, v_ref, w_ref, b_ref, out_ref, ctx_ref,
                *, batch, seq, heads, d_k):
    """Fused MHA forward over the whole (folded) batch.

    q/k/v refs: (B*S, D) bf16; w_ref: (4, D, D) bf16 [Wq, Wk, Wv, Wo];
    b_ref: (4, 1, D) f32 [bq, bk, bv, bo]; out_ref: (B*S, D) f32;
    ctx_ref: (B*S, D) f32 VMEM scratch (head-concat slab).
    """
    scale = 1.0 / math.sqrt(d_k)

    wq = w_ref[0]
    wk = w_ref[1]
    wv = w_ref[2]
    wo = w_ref[3]
    bq = b_ref[0]
    bk = b_ref[1]
    bv = b_ref[2]
    bo = b_ref[3]

    # Input projections over all B*S rows at once (bf16 MXU, f32 accumulate + bias).
    q = jnp.dot(q_ref[...], wq, preferred_element_type=jnp.float32) + bq
    k = jnp.dot(k_ref[...], wk, preferred_element_type=jnp.float32) + bk
    v = jnp.dot(v_ref[...], wv, preferred_element_type=jnp.float32) + bv

    q_bf = q.astype(jnp.bfloat16)
    k_bf = k.astype(jnp.bfloat16)
    v_bf = v.astype(jnp.bfloat16)

    # Scaled dot-product attention: small static (fully unrolled) loops over
    # batch and heads; per-head / per-batch slices are static sublane/lane slices.
    for b in range(batch):
        r0 = b * seq
        for h in range(heads):
            c0 = h * d_k
            qh = q_bf[r0:r0 + seq, c0:c0 + d_k]
            kh = k_bf[r0:r0 + seq, c0:c0 + d_k]
            vh = v_bf[r0:r0 + seq, c0:c0 + d_k]

            # scores = qh @ kh^T / sqrt(d_k)   (contract last dims, f32 accumulate)
            scores = lax.dot_general(
                qh, kh, (((1,), (1,)), ((), ())),
                preferred_element_type=jnp.float32) * scale

            # softmax over the key axis (kept in f32)
            scores = scores - jnp.max(scores, axis=-1, keepdims=True)
            p = jnp.exp(scores)
            p = p * pl.reciprocal(jnp.sum(p, axis=-1, keepdims=True), approx=True)

            ctx = jnp.dot(p.astype(jnp.bfloat16), vh,
                          preferred_element_type=jnp.float32)      # (S, d_k) f32

            # Write this head's context into the concat slab at its lane offset.
            ctx_ref[r0:r0 + seq, c0:c0 + d_k] = ctx

    # Single output projection on the head-concatenated slab.
    out_ref[...] = jnp.dot(ctx_ref[...].astype(jnp.bfloat16), wo,
                           preferred_element_type=jnp.float32) + bo


def mha_forward(q, k, v, params, heads):
    B, S, D = q.shape
    d_k = D // heads
    rows = B * S

    # Pack the 4 weights / 4 biases into single operands (2 DMA streams).
    w_stack = jnp.stack([params['wq'], params['wk'],
                         params['wv'], params['wo']]).astype(jnp.bfloat16)   # (4, D, D)
    b_stack = jnp.stack([params['bq'], params['bk'],
                         params['bv'], params['bo']])                        # (4, 1, D) f32

    # Fold the batch into rows; feed the MXU bf16 operands.
    q2 = q.reshape(rows, D).astype(jnp.bfloat16)
    k2 = k.reshape(rows, D).astype(jnp.bfloat16)
    v2 = v.reshape(rows, D).astype(jnp.bfloat16)

    kern = functools.partial(_mha_kernel, batch=B, seq=S, heads=heads, d_k=d_k)
    vmem_spec = lambda: pl.BlockSpec(memory_space=pltpu.MemorySpace.VMEM)

    out = pl.pallas_call(
        kern,
        out_shape=jax.ShapeDtypeStruct((rows, D), jnp.float32),
        in_specs=[vmem_spec() for _ in range(5)],
        out_specs=vmem_spec(),
        scratch_shapes=[pltpu.VMEM((rows, D), jnp.float32)],    # head-concat slab
    )(q2, k2, v2, w_stack, b_stack)

    return out.reshape(B, S, D)


# ----------------------------- pure-JAX reference --------------------------------------

def mha_reference(q, k, v, params, heads):
    B, S, D = q.shape
    d_k = D // heads

    def proj(x, w, b):
        return x @ w + b

    qp = proj(q, params['wq'], params['bq']).reshape(B, S, heads, d_k).transpose(0, 2, 1, 3)
    kp = proj(k, params['wk'], params['bk']).reshape(B, S, heads, d_k).transpose(0, 2, 1, 3)
    vp = proj(v, params['wv'], params['bv']).reshape(B, S, heads, d_k).transpose(0, 2, 1, 3)

    scores = jnp.einsum('bhqd,bhkd->bhqk', qp, kp) / math.sqrt(d_k)
    probs = jax.nn.softmax(scores, axis=-1)
    ctx = jnp.einsum('bhqk,bhkd->bhqd', probs, vp)
    concat = ctx.transpose(0, 2, 1, 3).reshape(B, S, D)
    return concat @ params['wo'] + params['bo']


# ----------------------------- main -----------------------------------------------------

if __name__ == "__main__":
    key = jax.random.PRNGKey(0)
    B, S, D, HEADS = 2, 8, 32, 4

    keys = jax.random.split(key, 12)
    q = jax.random.normal(keys[0], (B, S, D), jnp.float32)
    k = jax.random.normal(keys[1], (B, S, D), jnp.float32)
    v = jax.random.normal(keys[2], (B, S, D), jnp.float32)

    def lin(kw, kb):
        # Weights stored in (in, out) layout; forward computes x @ W + b
        # (equivalent to torch Linear with W == weight.T).
        w = 0.1 * jax.random.normal(kw, (D, D), jnp.float32)
        b = 0.1 * jax.random.normal(kb, (1, D), jnp.float32)
        return w, b

    wq, bq = lin(keys[3], keys[4])
    wk, bk = lin(keys[5], keys[6])
    wv, bv = lin(keys[7], keys[8])
    wo, bo = lin(keys[9], keys[10])
    params = dict(wq=wq, bq=bq, wk=wk, bk=bk, wv=wv, bv=bv, wo=wo, bo=bo)

    out = jax.jit(mha_forward, static_argnums=(4,))(q, k, v, params, HEADS)
    jax.block_until_ready(out)

    ref = mha_reference(q, k, v, params, HEADS)
    assert out.shape == (B, S, D) and out.dtype == jnp.float32
    # bf16 MXU operands vs f32 reference -> relaxed tolerance.
    max_err = float(jnp.max(jnp.abs(out - ref)))
    assert jnp.allclose(out, ref, atol=3e-2, rtol=3e-2), max_err
    print("KERNEL_OK")
</pallas_src>

<mosaic_0001>
module attributes {stable_mosaic.version = 11 : i64} {
  func.func @_mha_kernel(%arg0: memref<16x32xbf16, #tpu.memory_space<vmem>>, %arg1: memref<16x32xbf16, #tpu.memory_space<vmem>>, %arg2: memref<16x32xbf16, #tpu.memory_space<vmem>>, %arg3: memref<4x32x32xbf16, #tpu.memory_space<vmem>>, %arg4: memref<4x1x32xf32, #tpu.memory_space<vmem>>, %arg5: memref<16x32xf32, #tpu.memory_space<vmem>>, %arg6: memref<16x32xf32, #tpu.memory_space<vmem>>) attributes {dimension_semantics = [], scalar_prefetch = 0 : i64, scratch_operands = 1 : i64, tpu.core_type = #tpu.core_type<tc>} {
    %c0 = arith.constant 0 : index
    %c0_0 = arith.constant 0 : index
    %c0_1 = arith.constant 0 : index
    %0 = vector.load %arg3[%c0, %c0_0, %c0_1] : memref<4x32x32xbf16, #tpu.memory_space<vmem>>, vector<1x32x32xbf16>
    %1 = vector.shape_cast %0 : vector<1x32x32xbf16> to vector<32x32xbf16>
    %c1 = arith.constant 1 : index
    %c0_2 = arith.constant 0 : index
    %c0_3 = arith.constant 0 : index
    %2 = vector.load %arg3[%c1, %c0_2, %c0_3] : memref<4x32x32xbf16, #tpu.memory_space<vmem>>, vector<1x32x32xbf16>
    %3 = vector.shape_cast %2 : vector<1x32x32xbf16> to vector<32x32xbf16>
    %c2 = arith.constant 2 : index
    %c0_4 = arith.constant 0 : index
    %c0_5 = arith.constant 0 : index
    %4 = vector.load %arg3[%c2, %c0_4, %c0_5] : memref<4x32x32xbf16, #tpu.memory_space<vmem>>, vector<1x32x32xbf16>
    %5 = vector.shape_cast %4 : vector<1x32x32xbf16> to vector<32x32xbf16>
    %c3 = arith.constant 3 : index
    %c0_6 = arith.constant 0 : index
    %c0_7 = arith.constant 0 : index
    %6 = vector.load %arg3[%c3, %c0_6, %c0_7] : memref<4x32x32xbf16, #tpu.memory_space<vmem>>, vector<1x32x32xbf16>
    %7 = vector.shape_cast %6 : vector<1x32x32xbf16> to vector<32x32xbf16>
    %c0_8 = arith.constant 0 : index
    %c0_9 = arith.constant 0 : index
    %c0_10 = arith.constant 0 : index
    %8 = vector.load %arg4[%c0_8, %c0_9, %c0_10] : memref<4x1x32xf32, #tpu.memory_space<vmem>>, vector<1x1x32xf32>
    %9 = vector.shape_cast %8 : vector<1x1x32xf32> to vector<1x32xf32>
    %c1_11 = arith.constant 1 : index
    %c0_12 = arith.constant 0 : index
    %c0_13 = arith.constant 0 : index
    %10 = vector.load %arg4[%c1_11, %c0_12, %c0_13] : memref<4x1x32xf32, #tpu.memory_space<vmem>>, vector<1x1x32xf32>
    %11 = vector.shape_cast %10 : vector<1x1x32xf32> to vector<1x32xf32>
    %c2_14 = arith.constant 2 : index
    %c0_15 = arith.constant 0 : index
    %c0_16 = arith.constant 0 : index
    %12 = vector.load %arg4[%c2_14, %c0_15, %c0_16] : memref<4x1x32xf32, #tpu.memory_space<vmem>>, vector<1x1x32xf32>
    %13 = vector.shape_cast %12 : vector<1x1x32xf32> to vector<1x32xf32>
    %c3_17 = arith.constant 3 : index
    %c0_18 = arith.constant 0 : index
    %c0_19 = arith.constant 0 : index
    %14 = vector.load %arg4[%c3_17, %c0_18, %c0_19] : memref<4x1x32xf32, #tpu.memory_space<vmem>>, vector<1x1x32xf32>
    %15 = vector.shape_cast %14 : vector<1x1x32xf32> to vector<1x32xf32>
    %c0_20 = arith.constant 0 : index
    %c0_21 = arith.constant 0 : index
    %16 = vector.load %arg0[%c0_20, %c0_21] : memref<16x32xbf16, #tpu.memory_space<vmem>>, vector<16x32xbf16>
    %cst = arith.constant dense<0.000000e+00> : vector<16x32xf32>
    %17 = tpu.matmul %16, %1, %cst {dimension_numbers = #tpu.dot_dimension_numbers<[1], [0], [0], [1], [0, 0, 1, 1], [], []>} : vector<16x32xbf16>, vector<32x32xbf16>, vector<16x32xf32> -> vector<16x32xf32>
    %18 = vector.broadcast %9 : vector<1x32xf32> to vector<16x32xf32>
    %19 = arith.addf %17, %18 : vector<16x32xf32>
    %c0_22 = arith.constant 0 : index
    %c0_23 = arith.constant 0 : index
    %20 = vector.load %arg1[%c0_22, %c0_23] : memref<16x32xbf16, #tpu.memory_space<vmem>>, vector<16x32xbf16>
    %cst_24 = arith.constant dense<0.000000e+00> : vector<16x32xf32>
    %21 = tpu.matmul %20, %3, %cst_24 {dimension_numbers = #tpu.dot_dimension_numbers<[1], [0], [0], [1], [0, 0, 1, 1], [], []>} : vector<16x32xbf16>, vector<32x32xbf16>, vector<16x32xf32> -> vector<16x32xf32>
    %22 = vector.broadcast %11 : vector<1x32xf32> to vector<16x32xf32>
    %23 = arith.addf %21, %22 : vector<16x32xf32>
    %c0_25 = arith.constant 0 : index
    %c0_26 = arith.constant 0 : index
    %24 = vector.load %arg2[%c0_25, %c0_26] : memref<16x32xbf16, #tpu.memory_space<vmem>>, vector<16x32xbf16>
    %cst_27 = arith.constant dense<0.000000e+00> : vector<16x32xf32>
    %25 = tpu.matmul %24, %5, %cst_27 {dimension_numbers = #tpu.dot_dimension_numbers<[1], [0], [0], [1], [0, 0, 1, 1], [], []>} : vector<16x32xbf16>, vector<32x32xbf16>, vector<16x32xf32> -> vector<16x32xf32>
    %26 = vector.broadcast %13 : vector<1x32xf32> to vector<16x32xf32>
    %27 = arith.addf %25, %26 : vector<16x32xf32>
    %28 = arith.truncf %19 : vector<16x32xf32> to vector<16x32xbf16>
    %29 = arith.truncf %23 : vector<16x32xf32> to vector<16x32xbf16>
    %30 = arith.truncf %27 : vector<16x32xf32> to vector<16x32xbf16>
    %31 = vector.extract_strided_slice %28 {offsets = [0, 0], sizes = [8, 8], strides = [1, 1]} : vector<16x32xbf16> to vector<8x8xbf16>
    %32 = vector.extract_strided_slice %29 {offsets = [0, 0], sizes = [8, 8], strides = [1, 1]} : vector<16x32xbf16> to vector<8x8xbf16>
    %33 = vector.extract_strided_slice %30 {offsets = [0, 0], sizes = [8, 8], strides = [1, 1]} : vector<16x32xbf16> to vector<8x8xbf16>
    %cst_28 = arith.constant dense<0.000000e+00> : vector<8x8xf32>
    %34 = tpu.matmul %31, %32, %cst_28 {dimension_numbers = #tpu.dot_dimension_numbers<[1], [1], [0], [0], [0, 0, 1, 0], [], []>} : vector<8x8xbf16>, vector<8x8xbf16>, vector<8x8xf32> -> vector<8x8xf32>
    %cst_29 = arith.constant 0.353553385 : f32
    %35 = vector.broadcast %cst_29 : f32 to vector<8x8xf32>
    %36 = arith.mulf %34, %35 : vector<8x8xf32>
    %cst_30 = arith.constant dense<0xFF800000> : vector<8xf32>
    %37 = vector.multi_reduction <maximumf>, %36, %cst_30 [1] : vector<8x8xf32> to vector<8xf32>
    %38 = vector.shape_cast %37 : vector<8xf32> to vector<8x1xf32>
    %39 = vector.broadcast %38 : vector<8x1xf32> to vector<8x8xf32>
    %40 = arith.subf %36, %39 : vector<8x8xf32>
    %41 = math.exp %40 : vector<8x8xf32>
    %cst_31 = arith.constant dense<0.000000e+00> : vector<8xf32>
    %42 = vector.multi_reduction <add>, %41, %cst_31 [1] : vector<8x8xf32> to vector<8xf32>
    %43 = vector.shape_cast %42 : vector<8xf32> to vector<8x1xf32>
    %44 = tpu.reciprocal %43 {approx = true} : vector<8x1xf32> -> vector<8x1xf32>
    %45 = vector.broadcast %44 : vector<8x1xf32> to vector<8x8xf32>
    %46 = arith.mulf %41, %45 : vector<8x8xf32>
    %47 = arith.truncf %46 : vector<8x8xf32> to vector<8x8xbf16>
    %cst_32 = arith.constant dense<0.000000e+00> : vector<8x8xf32>
    %48 = tpu.matmul %47, %33, %cst_32 {dimension_numbers = #tpu.dot_dimension_numbers<[1], [0], [0], [1], [0, 0, 1, 1], [], []>} : vector<8x8xbf16>, vector<8x8xbf16>, vector<8x8xf32> -> vector<8x8xf32>
    %c0_33 = arith.constant 0 : index
    %c0_34 = arith.constant 0 : index
    %49 = vector.load %arg6[%c0_33, %c0_34] : memref<16x32xf32, #tpu.memory_space<vmem>>, vector<8x8xf32>
    tpu.vector_store %arg6[%c0_33, %c0_34], %48 {strides = array<i32>} : memref<16x32xf32, #tpu.memory_space<vmem>>, vector<8x8xf32>,
    %50 = vector.extract_strided_slice %28 {offsets = [0, 8], sizes = [8, 8], strides = [1, 1]} : vector<16x32xbf16> to vector<8x8xbf16>
    %51 = vector.extract_strided_slice %29 {offsets = [0, 8], sizes = [8, 8], strides = [1, 1]} : vector<16x32xbf16> to vector<8x8xbf16>
    %52 = vector.extract_strided_slice %30 {offsets = [0, 8], sizes = [8, 8], strides = [1, 1]} : vector<16x32xbf16> to vector<8x8xbf16>
    %cst_35 = arith.constant dense<0.000000e+00> : vector<8x8xf32>
    %53 = tpu.matmul %50, %51, %cst_35 {dimension_numbers = #tpu.dot_dimension_numbers<[1], [1], [0], [0], [0, 0, 1, 0], [], []>} : vector<8x8xbf16>, vector<8x8xbf16>, vector<8x8xf32> -> vector<8x8xf32>
    %cst_36 = arith.constant 0.353553385 : f32
    %54 = vector.broadcast %cst_36 : f32 to vector<8x8xf32>
    %55 = arith.mulf %53, %54 : vector<8x8xf32>
    %cst_37 = arith.constant dense<0xFF800000> : vector<8xf32>
    %56 = vector.multi_reduction <maximumf>, %55, %cst_37 [1] : vector<8x8xf32> to vector<8xf32>
    %57 = vector.shape_cast %56 : vector<8xf32> to vector<8x1xf32>
    %58 = vector.broadcast %57 : vector<8x1xf32> to vector<8x8xf32>
    %59 = arith.subf %55, %58 : vector<8x8xf32>
    %60 = math.exp %59 : vector<8x8xf32>
    %cst_38 = arith.constant dense<0.000000e+00> : vector<8xf32>
    %61 = vector.multi_reduction <add>, %60, %cst_38 [1] : vector<8x8xf32> to vector<8xf32>
    %62 = vector.shape_cast %61 : vector<8xf32> to vector<8x1xf32>
    %63 = tpu.reciprocal %62 {approx = true} : vector<8x1xf32> -> vector<8x1xf32>
    %64 = vector.broadcast %63 : vector<8x1xf32> to vector<8x8xf32>
    %65 = arith.mulf %60, %64 : vector<8x8xf32>
    %66 = arith.truncf %65 : vector<8x8xf32> to vector<8x8xbf16>
    %cst_39 = arith.constant dense<0.000000e+00> : vector<8x8xf32>
    %67 = tpu.matmul %66, %52, %cst_39 {dimension_numbers = #tpu.dot_dimension_numbers<[1], [0], [0], [1], [0, 0, 1, 1], [], []>} : vector<8x8xbf16>, vector<8x8xbf16>, vector<8x8xf32> -> vector<8x8xf32>
    %c0_40 = arith.constant 0 : index
    %c8 = arith.constant 8 : index
    %68 = vector.load %arg6[%c0_40, %c8] : memref<16x32xf32, #tpu.memory_space<vmem>>, vector<8x8xf32>
    tpu.vector_store %arg6[%c0_40, %c8], %67 {strides = array<i32>} : memref<16x32xf32, #tpu.memory_space<vmem>>, vector<8x8xf32>,
    %69 = vector.extract_strided_slice %28 {offsets = [0, 16], sizes = [8, 8], strides = [1, 1]} : vector<16x32xbf16> to vector<8x8xbf16>
    %70 = vector.extract_strided_slice %29 {offsets = [0, 16], sizes = [8, 8], strides = [1, 1]} : vector<16x32xbf16> to vector<8x8xbf16>
    %71 = vector.extract_strided_slice %30 {offsets = [0, 16], sizes = [8, 8], strides = [1, 1]} : vector<16x32xbf16> to vector<8x8xbf16>
    %cst_41 = arith.constant dense<0.000000e+00> : vector<8x8xf32>
    %72 = tpu.matmul %69, %70, %cst_41 {dimension_numbers = #tpu.dot_dimension_numbers<[1], [1], [0], [0], [0, 0, 1, 0], [], []>} : vector<8x8xbf16>, vector<8x8xbf16>, vector<8x8xf32> -> vector<8x8xf32>
    %cst_42 = arith.constant 0.353553385 : f32
    %73 = vector.broadcast %cst_42 : f32 to vector<8x8xf32>
    %74 = arith.mulf %72, %73 : vector<8x8xf32>
    %cst_43 = arith.constant dense<0xFF800000> : vector<8xf32>
    %75 = vector.multi_reduction <maximumf>, %74, %cst_43 [1] : vector<8x8xf32> to vector<8xf32>
    %76 = vector.shape_cast %75 : vector<8xf32> to vector<8x1xf32>
    %77 = vector.broadcast %76 : vector<8x1xf32> to vector<8x8xf32>
    %78 = arith.subf %74, %77 : vector<8x8xf32>
    %79 = math.exp %78 : vector<8x8xf32>
    %cst_44 = arith.constant dense<0.000000e+00> : vector<8xf32>
    %80 = vector.multi_reduction <add>, %79, %cst_44 [1] : vector<8x8xf32> to vector<8xf32>
    %81 = vector.shape_cast %80 : vector<8xf32> to vector<8x1xf32>
    %82 = tpu.reciprocal %81 {approx = true} : vector<8x1xf32> -> vector<8x1xf32>
    %83 = vector.broadcast %82 : vector<8x1xf32> to vector<8x8xf32>
    %84 = arith.mulf %79, %83 : vector<8x8xf32>
    %85 = arith.truncf %84 : vector<8x8xf32> to vector<8x8xbf16>
    %cst_45 = arith.constant dense<0.000000e+00> : vector<8x8xf32>
    %86 = tpu.matmul %85, %71, %cst_45 {dimension_numbers = #tpu.dot_dimension_numbers<[1], [0], [0], [1], [0, 0, 1, 1], [], []>} : vector<8x8xbf16>, vector<8x8xbf16>, vector<8x8xf32> -> vector<8x8xf32>
    %c0_46 = arith.constant 0 : index
    %c16 = arith.constant 16 : index
    %87 = vector.load %arg6[%c0_46, %c16] : memref<16x32xf32, #tpu.memory_space<vmem>>, vector<8x8xf32>
    tpu.vector_store %arg6[%c0_46, %c16], %86 {strides = array<i32>} : memref<16x32xf32, #tpu.memory_space<vmem>>, vector<8x8xf32>,
    %88 = vector.extract_strided_slice %28 {offsets = [0, 24], sizes = [8, 8], strides = [1, 1]} : vector<16x32xbf16> to vector<8x8xbf16>
    %89 = vector.extract_strided_slice %29 {offsets = [0, 24], sizes = [8, 8], strides = [1, 1]} : vector<16x32xbf16> to vector<8x8xbf16>
    %90 = vector.extract_strided_slice %30 {offsets = [0, 24], sizes = [8, 8], strides = [1, 1]} : vector<16x32xbf16> to vector<8x8xbf16>
    %cst_47 = arith.constant dense<0.000000e+00> : vector<8x8xf32>
    %91 = tpu.matmul %88, %89, %cst_47 {dimension_numbers = #tpu.dot_dimension_numbers<[1], [1], [0], [0], [0, 0, 1, 0], [], []>} : vector<8x8xbf16>, vector<8x8xbf16>, vector<8x8xf32> -> vector<8x8xf32>
    %cst_48 = arith.constant 0.353553385 : f32
    %92 = vector.broadcast %cst_48 : f32 to vector<8x8xf32>
    %93 = arith.mulf %91, %92 : vector<8x8xf32>
    %cst_49 = arith.constant dense<0xFF800000> : vector<8xf32>
    %94 = vector.multi_reduction <maximumf>, %93, %cst_49 [1] : vector<8x8xf32> to vector<8xf32>
    %95 = vector.shape_cast %94 : vector<8xf32> to vector<8x1xf32>
    %96 = vector.broadcast %95 : vector<8x1xf32> to vector<8x8xf32>
    %97 = arith.subf %93, %96 : vector<8x8xf32>
    %98 = math.exp %97 : vector<8x8xf32>
    %cst_50 = arith.constant dense<0.000000e+00> : vector<8xf32>
    %99 = vector.multi_reduction <add>, %98, %cst_50 [1] : vector<8x8xf32> to vector<8xf32>
    %100 = vector.shape_cast %99 : vector<8xf32> to vector<8x1xf32>
    %101 = tpu.reciprocal %100 {approx = true} : vector<8x1xf32> -> vector<8x1xf32>
    %102 = vector.broadcast %101 : vector<8x1xf32> to vector<8x8xf32>
    %103 = arith.mulf %98, %102 : vector<8x8xf32>
    %104 = arith.truncf %103 : vector<8x8xf32> to vector<8x8xbf16>
    %cst_51 = arith.constant dense<0.000000e+00> : vector<8x8xf32>
    %105 = tpu.matmul %104, %90, %cst_51 {dimension_numbers = #tpu.dot_dimension_numbers<[1], [0], [0], [1], [0, 0, 1, 1], [], []>} : vector<8x8xbf16>, vector<8x8xbf16>, vector<8x8xf32> -> vector<8x8xf32>
    %c0_52 = arith.constant 0 : index
    %c24 = arith.constant 24 : index
    %106 = vector.load %arg6[%c0_52, %c24] : memref<16x32xf32, #tpu.memory_space<vmem>>, vector<8x8xf32>
    tpu.vector_store %arg6[%c0_52, %c24], %105 {strides = array<i32>} : memref<16x32xf32, #tpu.memory_space<vmem>>, vector<8x8xf32>,
    %107 = vector.extract_strided_slice %28 {offsets = [8, 0], sizes = [8, 8], strides = [1, 1]} : vector<16x32xbf16> to vector<8x8xbf16>
    %108 = vector.extract_strided_slice %29 {offsets = [8, 0], sizes = [8, 8], strides = [1, 1]} : vector<16x32xbf16> to vector<8x8xbf16>
    %109 = vector.extract_strided_slice %30 {offsets = [8, 0], sizes = [8, 8], strides = [1, 1]} : vector<16x32xbf16> to vector<8x8xbf16>
    %cst_53 = arith.constant dense<0.000000e+00> : vector<8x8xf32>
    %110 = tpu.matmul %107, %108, %cst_53 {dimension_numbers = #tpu.dot_dimension_numbers<[1], [1], [0], [0], [0, 0, 1, 0], [], []>} : vector<8x8xbf16>, vector<8x8xbf16>, vector<8x8xf32> -> vector<8x8xf32>
    %cst_54 = arith.constant 0.353553385 : f32
    %111 = vector.broadcast %cst_54 : f32 to vector<8x8xf32>
    %112 = arith.mulf %110, %111 : vector<8x8xf32>
    %cst_55 = arith.constant dense<0xFF800000> : vector<8xf32>
    %113 = vector.multi_reduction <maximumf>, %112, %cst_55 [1] : vector<8x8xf32> to vector<8xf32>
    %114 = vector.shape_cast %113 : vector<8xf32> to vector<8x1xf32>
    %115 = vector.broadcast %114 : vector<8x1xf32> to vector<8x8xf32>
    %116 = arith.subf %112, %115 : vector<8x8xf32>
    %117 = math.exp %116 : vector<8x8xf32>
    %cst_56 = arith.constant dense<0.000000e+00> : vector<8xf32>
    %118 = vector.multi_reduction <add>, %117, %cst_56 [1] : vector<8x8xf32> to vector<8xf32>
    %119 = vector.shape_cast %118 : vector<8xf32> to vector<8x1xf32>
    %120 = tpu.reciprocal %119 {approx = true} : vector<8x1xf32> -> vector<8x1xf32>
    %121 = vector.broadcast %120 : vector<8x1xf32> to vector<8x8xf32>
    %122 = arith.mulf %117, %121 : vector<8x8xf32>
    %123 = arith.truncf %122 : vector<8x8xf32> to vector<8x8xbf16>
    %cst_57 = arith.constant dense<0.000000e+00> : vector<8x8xf32>
    %124 = tpu.matmul %123, %109, %cst_57 {dimension_numbers = #tpu.dot_dimension_numbers<[1], [0], [0], [1], [0, 0, 1, 1], [], []>} : vector<8x8xbf16>, vector<8x8xbf16>, vector<8x8xf32> -> vector<8x8xf32>
    %c8_58 = arith.constant 8 : index
    %c0_59 = arith.constant 0 : index
    %125 = vector.load %arg6[%c8_58, %c0_59] : memref<16x32xf32, #tpu.memory_space<vmem>>, vector<8x8xf32>
    tpu.vector_store %arg6[%c8_58, %c0_59], %124 {strides = array<i32>} : memref<16x32xf32, #tpu.memory_space<vmem>>, vector<8x8xf32>,
    %126 = vector.extract_strided_slice %28 {offsets = [8, 8], sizes = [8, 8], strides = [1, 1]} : vector<16x32xbf16> to vector<8x8xbf16>
    %127 = vector.extract_strided_slice %29 {offsets = [8, 8], sizes = [8, 8], strides = [1, 1]} : vector<16x32xbf16> to vector<8x8xbf16>
    %128 = vector.extract_strided_slice %30 {offsets = [8, 8], sizes = [8, 8], strides = [1, 1]} : vector<16x32xbf16> to vector<8x8xbf16>
    %cst_60 = arith.constant dense<0.000000e+00> : vector<8x8xf32>
    %129 = tpu.matmul %126, %127, %cst_60 {dimension_numbers = #tpu.dot_dimension_numbers<[1], [1], [0], [0], [0, 0, 1, 0], [], []>} : vector<8x8xbf16>, vector<8x8xbf16>, vector<8x8xf32> -> vector<8x8xf32>
    %cst_61 = arith.constant 0.353553385 : f32
    %130 = vector.broadcast %cst_61 : f32 to vector<8x8xf32>
    %131 = arith.mulf %129, %130 : vector<8x8xf32>
    %cst_62 = arith.constant dense<0xFF800000> : vector<8xf32>
    %132 = vector.multi_reduction <maximumf>, %131, %cst_62 [1] : vector<8x8xf32> to vector<8xf32>
    %133 = vector.shape_cast %132 : vector<8xf32> to vector<8x1xf32>
    %134 = vector.broadcast %133 : vector<8x1xf32> to vector<8x8xf32>
    %135 = arith.subf %131, %134 : vector<8x8xf32>
    %136 = math.exp %135 : vector<8x8xf32>
    %cst_63 = arith.constant dense<0.000000e+00> : vector<8xf32>
    %137 = vector.multi_reduction <add>, %136, %cst_63 [1] : vector<8x8xf32> to vector<8xf32>
    %138 = vector.shape_cast %137 : vector<8xf32> to vector<8x1xf32>
    %139 = tpu.reciprocal %138 {approx = true} : vector<8x1xf32> -> vector<8x1xf32>
    %140 = vector.broadcast %139 : vector<8x1xf32> to vector<8x8xf32>
    %141 = arith.mulf %136, %140 : vector<8x8xf32>
    %142 = arith.truncf %141 : vector<8x8xf32> to vector<8x8xbf16>
    %cst_64 = arith.constant dense<0.000000e+00> : vector<8x8xf32>
    %143 = tpu.matmul %142, %128, %cst_64 {dimension_numbers = #tpu.dot_dimension_numbers<[1], [0], [0], [1], [0, 0, 1, 1], [], []>} : vector<8x8xbf16>, vector<8x8xbf16>, vector<8x8xf32> -> vector<8x8xf32>
    %c8_65 = arith.constant 8 : index
    %c8_66 = arith.constant 8 : index
    %144 = vector.load %arg6[%c8_65, %c8_66] : memref<16x32xf32, #tpu.memory_space<vmem>>, vector<8x8xf32>
    tpu.vector_store %arg6[%c8_65, %c8_66], %143 {strides = array<i32>} : memref<16x32xf32, #tpu.memory_space<vmem>>, vector<8x8xf32>,
    %145 = vector.extract_strided_slice %28 {offsets = [8, 16], sizes = [8, 8], strides = [1, 1]} : vector<16x32xbf16> to vector<8x8xbf16>
    %146 = vector.extract_strided_slice %29 {offsets = [8, 16], sizes = [8, 8], strides = [1, 1]} : vector<16x32xbf16> to vector<8x8xbf16>
    %147 = vector.extract_strided_slice %30 {offsets = [8, 16], sizes = [8, 8], strides = [1, 1]} : vector<16x32xbf16> to vector<8x8xbf16>
    %cst_67 = arith.constant dense<0.000000e+00> : vector<8x8xf32>
    %148 = tpu.matmul %145, %146, %cst_67 {dimension_numbers = #tpu.dot_dimension_numbers<[1], [1], [0], [0], [0, 0, 1, 0], [], []>} : vector<8x8xbf16>, vector<8x8xbf16>, vector<8x8xf32> -> vector<8x8xf32>
    %cst_68 = arith.constant 0.353553385 : f32
    %149 = vector.broadcast %cst_68 : f32 to vector<8x8xf32>
    %150 = arith.mulf %148, %149 : vector<8x8xf32>
    %cst_69 = arith.constant dense<0xFF800000> : vector<8xf32>
    %151 = vector.multi_reduction <maximumf>, %150, %cst_69 [1] : vector<8x8xf32> to vector<8xf32>
    %152 = vector.shape_cast %151 : vector<8xf32> to vector<8x1xf32>
    %153 = vector.broadcast %152 : vector<8x1xf32> to vector<8x8xf32>
    %154 = arith.subf %150, %153 : vector<8x8xf32>
    %155 = math.exp %154 : vector<8x8xf32>
    %cst_70 = arith.constant dense<0.000000e+00> : vector<8xf32>
    %156 = vector.multi_reduction <add>, %155, %cst_70 [1] : vector<8x8xf32> to vector<8xf32>
    %157 = vector.shape_cast %156 : vector<8xf32> to vector<8x1xf32>
    %158 = tpu.reciprocal %157 {approx = true} : vector<8x1xf32> -> vector<8x1xf32>
    %159 = vector.broadcast %158 : vector<8x1xf32> to vector<8x8xf32>
    %160 = arith.mulf %155, %159 : vector<8x8xf32>
    %161 = arith.truncf %160 : vector<8x8xf32> to vector<8x8xbf16>
    %cst_71 = arith.constant dense<0.000000e+00> : vector<8x8xf32>
    %162 = tpu.matmul %161, %147, %cst_71 {dimension_numbers = #tpu.dot_dimension_numbers<[1], [0], [0], [1], [0, 0, 1, 1], [], []>} : vector<8x8xbf16>, vector<8x8xbf16>, vector<8x8xf32> -> vector<8x8xf32>
    %c8_72 = arith.constant 8 : index
    %c16_73 = arith.constant 16 : index
    %163 = vector.load %arg6[%c8_72, %c16_73] : memref<16x32xf32, #tpu.memory_space<vmem>>, vector<8x8xf32>
    tpu.vector_store %arg6[%c8_72, %c16_73], %162 {strides = array<i32>} : memref<16x32xf32, #tpu.memory_space<vmem>>, vector<8x8xf32>,
    %164 = vector.extract_strided_slice %28 {offsets = [8, 24], sizes = [8, 8], strides = [1, 1]} : vector<16x32xbf16> to vector<8x8xbf16>
    %165 = vector.extract_strided_slice %29 {offsets = [8, 24], sizes = [8, 8], strides = [1, 1]} : vector<16x32xbf16> to vector<8x8xbf16>
    %166 = vector.extract_strided_slice %30 {offsets = [8, 24], sizes = [8, 8], strides = [1, 1]} : vector<16x32xbf16> to vector<8x8xbf16>
    %cst_74 = arith.constant dense<0.000000e+00> : vector<8x8xf32>
    %167 = tpu.matmul %164, %165, %cst_74 {dimension_numbers = #tpu.dot_dimension_numbers<[1], [1], [0], [0], [0, 0, 1, 0], [], []>} : vector<8x8xbf16>, vector<8x8xbf16>, vector<8x8xf32> -> vector<8x8xf32>
    %cst_75 = arith.constant 0.353553385 : f32
    %168 = vector.broadcast %cst_75 : f32 to vector<8x8xf32>
    %169 = arith.mulf %167, %168 : vector<8x8xf32>
    %cst_76 = arith.constant dense<0xFF800000> : vector<8xf32>
    %170 = vector.multi_reduction <maximumf>, %169, %cst_76 [1] : vector<8x8xf32> to vector<8xf32>
    %171 = vector.shape_cast %170 : vector<8xf32> to vector<8x1xf32>
    %172 = vector.broadcast %171 : vector<8x1xf32> to vector<8x8xf32>
    %173 = arith.subf %169, %172 : vector<8x8xf32>
    %174 = math.exp %173 : vector<8x8xf32>
    %cst_77 = arith.constant dense<0.000000e+00> : vector<8xf32>
    %175 = vector.multi_reduction <add>, %174, %cst_77 [1] : vector<8x8xf32> to vector<8xf32>
    %176 = vector.shape_cast %175 : vector<8xf32> to vector<8x1xf32>
    %177 = tpu.reciprocal %176 {approx = true} : vector<8x1xf32> -> vector<8x1xf32>
    %178 = vector.broadcast %177 : vector<8x1xf32> to vector<8x8xf32>
    %179 = arith.mulf %174, %178 : vector<8x8xf32>
    %180 = arith.truncf %179 : vector<8x8xf32> to vector<8x8xbf16>
    %cst_78 = arith.constant dense<0.000000e+00> : vector<8x8xf32>
    %181 = tpu.matmul %180, %166, %cst_78 {dimension_numbers = #tpu.dot_dimension_numbers<[1], [0], [0], [1], [0, 0, 1, 1], [], []>} : vector<8x8xbf16>, vector<8x8xbf16>, vector<8x8xf32> -> vector<8x8xf32>
    %c8_79 = arith.constant 8 : index
    %c24_80 = arith.constant 24 : index
    %182 = vector.load %arg6[%c8_79, %c24_80] : memref<16x32xf32, #tpu.memory_space<vmem>>, vector<8x8xf32>
    tpu.vector_store %arg6[%c8_79, %c24_80], %181 {strides = array<i32>} : memref<16x32xf32, #tpu.memory_space<vmem>>, vector<8x8xf32>,
    %c0_81 = arith.constant 0 : index
    %c0_82 = arith.constant 0 : index
    %183 = vector.load %arg6[%c0_81, %c0_82] : memref<16x32xf32, #tpu.memory_space<vmem>>, vector<16x32xf32>
    %184 = arith.truncf %183 : vector<16x32xf32> to vector<16x32xbf16>
    %cst_83 = arith.constant dense<0.000000e+00> : vector<16x32xf32>
    %185 = tpu.matmul %184, %7, %cst_83 {dimension_numbers = #tpu.dot_dimension_numbers<[1], [0], [0], [1], [0, 0, 1, 1], [], []>} : vector<16x32xbf16>, vector<32x32xbf16>, vector<16x32xf32> -> vector<16x32xf32>
    %186 = vector.broadcast %15 : vector<1x32xf32> to vector<16x32xf32>
    %187 = arith.addf %185, %186 : vector<16x32xf32>
    %c0_84 = arith.constant 0 : index
    %c0_85 = arith.constant 0 : index
    %188 = vector.load %arg5[%c0_84, %c0_85] : memref<16x32xf32, #tpu.memory_space<vmem>>, vector<16x32xf32>
    tpu.vector_store %arg5[%c0_84, %c0_85], %187 {strides = array<i32>} : memref<16x32xf32, #tpu.memory_space<vmem>>, vector<16x32xf32>,
    return
  }
}

</mosaic_0001>

<bundles_post_ra>
// kernel: mha_forward.1
= control target key start
LH: loop header
LB: loop body
LE: loop exit
PB: predicated region body
PF: predicated region fallthrough
CT: control target
= control target key end

     0   :  { %v1560_v1 = vmov 0.0   ;;  %vm1561_vm0 = vmmov 0   ;;  %vm73_vm1 = vcmask 261120   ;;  %s1853_s0 = inlined_call_operand.vmem [shape: bf16[16,32], index: 0, kind: input, shape index: {}]   ;;  %s1854_s1 = inlined_call_operand.vmem [shape: bf16[16,32], index: 1, kind: input, shape index: {}]   ;;  %s1855_s2 = inlined_call_operand.vmem [shape: bf16[16,32], index: 2, kind: input, shape index: {}]   ;;  %s1856_s3 = inlined_call_operand.vmem [shape: bf16[4,32,32], index: 3, kind: input, shape index: {}]   ;;  %s1857_s4 = inlined_call_operand.vmem [shape: f32[4,1,32], index: 4, kind: input, shape index: {}]   ;;  %s1858_s5 = inlined_call_operand.hbm [shape: f32[16,32], index: 5, kind: output, shape index: {}]  }
   0x1   :  { %v1493_v0 = vld [vmem:[%s1856_s3 + $0x10] sm:$0xff]   ;;  %1363 = vmatprep.subr.bf16.mxu1 %v1560_v1  ;;  %1355 = vmatprep.subr.bf16.mxu0 %v1560_v1  ;;  %v1494_v2 = vld [vmem:[%s1856_s3] sm:$0xff]   ;;  %v1495_v3 = vld [vmem:[%s1856_s3 + $0x18] sm:$0xff]  }
   0x2   :  { %1364 = vmatpush3.bf16.msra.mxu1 %v1493_v0  ;;  %1367 = vmatprep.mubr.msk.bf16.mxu1 %vm1561_vm0, %v1560_v1  ;;  %v1497_v4 = vld [vmem:[%s1856_s3 + $0x8] sm:$0xff]   ;;  %v1496_v5 = vld [vmem:[%s1854_s1] sm:$0xff]  }
   0x3   :  { %1365 = vmatprep.subr.bf16.mxu1 %v1560_v1  ;;  %1356 = vmatpush3.bf16.msra.mxu0 %v1494_v2  ;;  %v1498_v6 = vld [vmem:[%s1853_s0] sm:$0xff]  }
   0x4   :  { %1357 = vmatprep.subr.bf16.mxu0 %v1560_v1  ;;  %1359 = vmatprep.mubr.msk.bf16.mxu0 %vm1561_vm0, %v1560_v1 }
   0x6   :  { %1366 = vmatpush3.bf16.msra.mxu1 %v1495_v3 }
   0x7   :  { %1358 = vmatpush3.bf16.msra.mxu0 %v1497_v4  ;;  %1379 = vmatprep.subr.bf16.mxu1 %v1560_v1 }
   0x8   :  { %1371 = vmatprep.subr.bf16.mxu0 %v1560_v1 }
   0x9   :  { %1368 = vmatmul.mubr.msk.bf16.vlgmr.msra.gmra.mrb[0].mxu1 %vm73_vm1, %v1496_v5 }
   0xa   :  { %10 = vsyncpa [#allocation4], 0  ;;  %1360 = vmatmul.mubr.msk.bf16.vlgmr.msra.gmra.mrb[0].mxu0 %vm73_vm1, %v1498_v6  ;;  %1381 = vmatprep.mubr.msk.bf16.mxu1 %vm1561_vm0, %v1560_v1  ;;  %v1276_v7 = vld [vmem:[%s1857_s4] ss:$0 sm:$0xff]  ;;  %v1281_v8 = vld [vmem:[%s1857_s4 + $0x1] ss:$0 sm:$0xff] }
   0xb   :  { %1375 = vmatprep.mubr.msk.bf16.mxu0 %vm1561_vm0, %v1560_v1  ;;  %vm259_vm2 = vcmask 64512   ;;  %s1562_s7 = smov 112   ;;  %s1563_s8 = smov 120   ;;  %v1499_v26 = vld [vmem:[%s1856_s3 + $0x20] sm:$0xff]   ;;  %v1500_v27 = vld [vmem:[%s1856_s3 + $0x28] sm:$0xff]   ;;  %vm322_vm3 = vcmask 1043456  }
   0xc   :  { %s1564_s9 = smov 104   ;;  %1372 = vmatpush3.bf16.msra.mxu0 %v1499_v26  ;;  %v1501_v28 = vld [vmem:[%s1855_s2] sm:$0xff]   ;;  %s1565_s17 = smov 8   ;;  %vm485_vm4 = vcmask 130112   ;;  %vm602_vm5 = vcmask 195712   ;;  %vm719_vm6 = vcmask 261312  }
   0xd   :  { %1373 = vmatprep.subr.bf16.mxu0 %v1560_v1  ;;  %s1566_s18 = smov 16   ;;  %s1567_s19 = smov 24  }
   0xe   :  { %s1568_s25 = smov [#allocation3]  }
   0xf   :  { %s1250_s26 = sshll.u32 %s1568_s25, 4  ;;  %s1251_s26 = int_to_ptr.vmem [resolvable:$true] %s1250_s26 }
  0x10   :  { %1374 = vmatpush3.bf16.msra.mxu0 %v1500_v27  ;;  %s1536_s27 = scalar_lea.vmem %s1251_s26, 256  ;;  %p1541_p1 = scmp.lt.s32.totalorder %s1251_s26, %s1251_s26 }
  0x11   :  { %1385 = vmatprep.subr.bf16.mxu0 %v1560_v1  ;;  %p1537_p0 = scmp.ne.s32.totalorder %s1251_s26, %s1536_s27  ;;  %p1542_p2 = scmp.lt.s32.totalorder %s1536_s27, %s1536_s27 }
  0x13   :  { %1376 = vmatmul.mubr.msk.bf16.vlgmr.msra.gmra.mrb[4].mxu0 %vm73_vm1, %v1501_v28  ;;  %p1543_p3 = por %p1542_p2, %p1541_p1 }
  0x14   :  { %1387 = vmatprep.mubr.msk.bf16.mxu0 %vm1561_vm0, %v1560_v1 }
  0x15   :  { %p1544_p4 = pnand %p1543_p3, %p1537_p0 }
  0xdc   :  { %v180_v9 = vpop.f32.mrb[0].mxu1 }
  0xdd   :  { %v1369_v10 = vpop.f32.mrb[1].mxu1  ;;  %v111_v11 = vpop.f32.mrb[0].mxu0  ;;  %v181_v15 = vadd.f32 %v1281_v8, %v180_v9 }
  0xde   :  { %v183_v12 = vpop.f32.mrb[2].mxu1  ;;  %v112_v13 = vadd.f32 %v1276_v7, %v111_v11  ;;  %v1361_v14 = vpop.f32.mrb[1].mxu0 }
  0xdf   :  { %v184_v16 = vadd.f32 %v1281_v8, %v183_v12  ;;  %v1370_v17 = vpop.f32.mrb[3].mxu1  ;;  %v114_v18 = vpop.f32.mrb[2].mxu0 }
  0xe0   :  { %v115_v19 = vadd.f32 %v1276_v7, %v114_v18  ;;  %v1362_v20 = vpop.f32.mrb[3].mxu0 }
  0xe1   :  { %v257_v21 = vpack.c.bf16 %v184_v16, %v181_v15 }
  0xe2   :  { %v256_v22 = vpack.c.bf16 %v115_v19, %v112_v13 }
  0xe3   :  { %489 = vrot.lane.b32.xlu1 %v257_v21, %s1562_s7  ;;  %371 = vrot.lane.b32.xlu0 %v257_v21, %s1563_s8  ;;  %v264_v23 = vsel %vm259_vm2, %v257_v21, 0  ;;  %v722_v24 = vrot.slane %v257_v21, 4 }
  0xe4   :  { %1380 = vmatpush3.bf16.xpose.msra.mxu1 %v264_v23  ;;  %v721_v25 = vrot.slane %v256_v22, 4 }
  0xe5   :  { %1391 = vmatprep.subr.bf16.mxu1 %v1560_v1  ;;  %v727_v38 = vsel %vm259_vm2, %v722_v24, 0 }
  0xe7   :  { %487 = vrot.lane.b32.xlu1 %v256_v22, %s1562_s7  ;;  %368 = vrot.lane.b32.xlu0 %v256_v22, %s1563_s8 }
  0xeb   :  { %604 = vrot.lane.b32.xlu1 %v256_v22, %s1564_s9  ;;  %606 = vrot.lane.b32.xlu0 %v257_v21, %s1564_s9 }
  0xec   :  { %1382 = vmatmul.mubr.msk.bf16.vlgmr.msra.gmra.mrb[4].mxu1 %vm259_vm2, %v256_v22 }
  0xed   :  { %1393 = vmatprep.mubr.msk.bf16.mxu1 %vm1561_vm0, %v1560_v1 }
  0xef   :  { %832 = vrot.lane.b32.xlu0 %v722_v24, %s1563_s8  ;;  %830 = vrot.lane.b32.xlu1 %v721_v25, %s1563_s8 }
  0xf3   :  { %948 = vrot.lane.b32.xlu0 %v722_v24, %s1562_s7  ;;  %946 = vrot.lane.b32.xlu1 %v721_v25, %s1562_s7 }
  0xf7   :  { %1064 = vrot.lane.b32.xlu0 %v722_v24, %s1564_s9  ;;  %1062 = vrot.lane.b32.xlu1 %v721_v25, %s1564_s9 }
 0x155   :  { %v372_v29 = vpop.permute.xlu0 %371  ;;  %v490_v31 = vpop.permute.xlu1 %489 }
 0x156   :  { %v377_v30 = vsel %vm259_vm2, %v372_v29, 0  ;;  %v495_v33 = vsel %vm259_vm2, %v490_v31, 0 }
 0x157   :  { %1392 = vmatpush3.bf16.xpose.msra.mxu1 %v377_v30 }
 0x158   :  { %1403 = vmatprep.subr.bf16.mxu1 %v1560_v1 }
 0x159   :  { %v369_v32 = vpop.permute.xlu0 %368  ;;  %v488_v35 = vpop.permute.xlu1 %487 }
 0x15d   :  { %v607_v34 = vpop.permute.xlu0 %606  ;;  %v605_v37 = vpop.permute.xlu1 %604 }
 0x15e   :  { %1394 = vmatmul.mubr.msk.bf16.vlgmr.msra.gmra.mrb[8].mxu1 %vm259_vm2, %v369_v32  ;;  %v612_v36 = vsel %vm259_vm2, %v607_v34, 0 }
 0x15f   :  { %1404 = vmatpush3.bf16.xpose.msra.mxu1 %v495_v33  ;;  %1405 = vmatprep.mubr.msk.bf16.mxu1 %vm1561_vm0, %v1560_v1 }
 0x160   :  { %1415 = vmatprep.subr.bf16.mxu1 %v1560_v1 }
 0x161   :  { %v833_v39 = vpop.permute.xlu0 %832  ;;  %v831_v42 = vpop.permute.xlu1 %830 }
 0x162   :  { %v838_v40 = vsel %vm259_vm2, %v833_v39, 0 }
 0x165   :  { %v949_v41 = vpop.permute.xlu0 %948  ;;  %v947_v45 = vpop.permute.xlu1 %946 }
 0x166   :  { %1406 = vmatmul.mubr.msk.bf16.vlgmr.msra.gmra.mrb[12].mxu1 %vm259_vm2, %v488_v35  ;;  %v954_v43 = vsel %vm259_vm2, %v949_v41, 0  ;;  %v1286_v41 = vld [vmem:[%s1857_s4 + $0x2] ss:$0 sm:$0xff] }
 0x167   :  { %1416 = vmatpush3.bf16.xpose.msra.mxu1 %v612_v36  ;;  %1417 = vmatprep.mubr.msk.bf16.mxu1 %vm1561_vm0, %v1560_v1  ;;  %v249_v36 = vpop.f32.mrb[4].mxu0 }
 0x168   :  { %1427 = vmatprep.subr.bf16.mxu1 %v1560_v1  ;;  %v1377_v39 = vpop.f32.mrb[5].mxu0 }
 0x169   :  { %v1065_v44 = vpop.permute.xlu0 %1064  ;;  %v1063_v47 = vpop.permute.xlu1 %1062 }
 0x16a   :  { %v1070_v46 = vsel %vm259_vm2, %v1065_v44, 0 }
 0x16e   :  { %1418 = vmatmul.mubr.msk.bf16.vlgmr.msra.gmra.mrb[16].mxu1 %vm259_vm2, %v605_v37 }
 0x16f   :  { %1428 = vmatpush3.bf16.xpose.msra.mxu1 %v727_v38  ;;  %1429 = vmatprep.mubr.msk.bf16.mxu1 %vm1561_vm0, %v1560_v1 }
 0x170   :  { %1439 = vmatprep.subr.bf16.mxu1 %v1560_v1 }
 0x176   :  { %1430 = vmatmul.mubr.msk.bf16.vlgmr.msra.gmra.mrb[20].mxu1 %vm259_vm2, %v721_v25 }
 0x177   :  { %1440 = vmatpush3.bf16.xpose.msra.mxu1 %v838_v40  ;;  %1441 = vmatprep.mubr.msk.bf16.mxu1 %vm1561_vm0, %v1560_v1  ;;  %v252_v40 = vpop.f32.mrb[6].mxu0 }
 0x178   :  { %1451 = vmatprep.subr.bf16.mxu1 %v1560_v1  ;;  %v253_v44 = vadd.f32 %v1286_v41, %v252_v40 }
 0x17e   :  { %1442 = vmatmul.mubr.msk.bf16.vlgmr.msra.gmra.mrb[24].mxu1 %vm259_vm2, %v831_v42  ;;  %v1378_v42 = vpop.f32.mrb[7].mxu0 }
 0x17f   :  { %1452 = vmatpush3.bf16.xpose.msra.mxu1 %v954_v43  ;;  %1453 = vmatprep.mubr.msk.bf16.mxu1 %vm1561_vm0, %v1560_v1  ;;  %v250_v43 = vadd.f32 %v1286_v41, %v249_v36 }
 0x180   :  { %1463 = vmatprep.subr.bf16.mxu1 %v1560_v1 }
 0x186   :  { %1454 = vmatmul.mubr.msk.bf16.vlgmr.msra.gmra.mrb[28].mxu1 %vm259_vm2, %v947_v45  ;;  %v1739_v45 = vpack.c.bf16 %v253_v44, %v250_v43 }
 0x187   :  { %1464 = vmatpush3.bf16.xpose.msra.mxu1 %v1070_v46  ;;  %1465 = vmatprep.mubr.msk.bf16.mxu1 %vm1561_vm0, %v1560_v1 }
 0x188   :  { %1475 = vmatprep.subr.bf16.mxu1 %v1560_v1  ;;  %v324_v46 = vsel %vm322_vm3, %v1739_v45, 0 }
 0x189   :  { %1386 = vmatpush3.bf16.msra.mxu0 %v324_v46 }
 0x18a   :  { %1397 = vmatprep.subr.bf16.mxu0 %v1560_v1 }
 0x18e   :  { %1466 = vmatmul.mubr.msk.bf16.vlgmr.msra.gmra.mrb[32].mxu1 %vm259_vm2, %v1063_v47 }
 0x18f   :  { %1479 = vmatprep.mubr.msk.bf16.mxu1 %vm1561_vm0, %v1560_v1 }
 0x1bf   :  { %v300_v48 = vpop.f32.mrb[4].mxu1 }
 0x1c0   :  { %v306_v49 = vmul.f32 0.35355338, %v300_v48  ;;  %v1383_v50 = vpop.f32.mrb[5].mxu1 }
 0x1c1   :  { %v303_v51 = vpop.f32.mrb[6].mxu1 }
 0x1c2   :  { %v1384_v52 = vpop.f32.mrb[7].mxu1  ;;  %v307_v53 = vsel %vm259_vm2, %v306_v49, -inf }
 0x1c3   :  { %308 = vmax.xlane.f32.xlu0 %v307_v53 }
 0x231   :  { %v413_v54 = vpop.f32.mrb[8].mxu1 }
 0x232   :  { %v1707_v55 = vmul.f32 0.35355338, %v413_v54  ;;  %v1395_v56 = vpop.f32.mrb[9].mxu1 }
 0x233   :  { %v416_v57 = vpop.f32.mrb[10].mxu1 }
 0x234   :  { %v1396_v58 = vpop.f32.mrb[11].mxu1  ;;  %v420_v59 = vsel %vm259_vm2, %v1707_v55, -inf }
 0x235   :  { %421 = vmax.xlane.f32.xlu1 %v420_v59 }
 0x239   :  { %v531_v60 = vpop.f32.mrb[12].mxu1 }
 0x23a   :  { %v1711_v61 = vmul.f32 0.35355338, %v531_v60  ;;  %v1407_v62 = vpop.f32.mrb[13].mxu1 }
 0x23b   :  { %v534_v63 = vpop.f32.mrb[14].mxu1 }
 0x23c   :  { %v1408_v0 = vpop.f32.mrb[15].mxu1  ;;  %v538_v2 = vsel %vm259_vm2, %v1711_v61, -inf }
 0x23d   :  { %539 = vmax.xlane.f32.xlu0 %v538_v2 }
 0x241   :  { %v648_v3 = vpop.f32.mrb[16].mxu1 }
 0x242   :  { %v1715_v4 = vmul.f32 0.35355338, %v648_v3  ;;  %v1419_v5 = vpop.f32.mrb[17].mxu1 }
 0x243   :  { %v651_v6 = vpop.f32.mrb[18].mxu1 }
 0x244   :  { %v1420_v7 = vpop.f32.mrb[19].mxu1  ;;  %v655_v8 = vsel %vm259_vm2, %v1715_v4, -inf }
 0x245   :  { %656 = vmax.xlane.f32.xlu0 %v655_v8 }
 0x249   :  { %v763_v9 = vpop.f32.mrb[20].mxu1 }
 0x24a   :  { %v1719_v10 = vmul.f32 0.35355338, %v763_v9  ;;  %v1431_v11 = vpop.f32.mrb[21].mxu1 }
 0x24b   :  { %v766_v12 = vpop.f32.mrb[22].mxu1 }
 0x24c   :  { %v1432_v13 = vpop.f32.mrb[23].mxu1  ;;  %v770_v14 = vsel %vm259_vm2, %v1719_v10, -inf }
 0x24d   :  { %771 = vmax.xlane.f32.xlu1 %v770_v14 }
 0x250   :  { %v309_v15 = vpop.xlane.xlu0 %308 }
 0x251   :  { %v310_v16 = vsub.f32 %v306_v49, %v309_v15  ;;  %v874_v17 = vpop.f32.mrb[24].mxu1 }
 0x252   :  { %v1723_v18 = vmul.f32 0.35355338, %v874_v17  ;;  %v1443_v19 = vpop.f32.mrb[25].mxu1 }
 0x253   :  { %v311_v20 = vmul.f32 1.442695, %v310_v16  ;;  %v877_v21 = vpop.f32.mrb[26].mxu1 }
 0x254   :  { %v1444_v22 = vpop.f32.mrb[27].mxu1  ;;  %v881_v23 = vsel %vm259_vm2, %v1723_v18, -inf }
 0x255   :  { %1504 = vpow2.f32 %v311_v20  ;;  %882 = vmax.xlane.f32.xlu0 %v881_v23  ;;  %v782_v23 = vrot.slane %v1739_v45, 4 }
 0x257   :  { %v787_v42 = vsel %vm322_vm3, %v782_v23, 0 }
 0x259   :  { %v990_v24 = vpop.f32.mrb[28].mxu1 }
 0x25a   :  { %v1727_v25 = vmul.f32 0.35355338, %v990_v24  ;;  %v1455_v26 = vpop.f32.mrb[29].mxu1 }
 0x25b   :  { %v993_v27 = vpop.f32.mrb[30].mxu1 }
 0x25c   :  { %v1456_v28 = vpop.f32.mrb[31].mxu1  ;;  %v997_v29 = vsel %vm259_vm2, %v1727_v25, -inf }
 0x25d   :  { %998 = vmax.xlane.f32.xlu1 %v997_v29 }
 0x25f   :  { %v1505_v30 = vpop.eup %1504 }
 0x260   :  { %v313_v31 = vsel %vm259_vm2, %v1505_v30, 0.0 }
 0x261   :  { %314 = vadd.xlane.f32.xlu1 %v313_v31  ;;  %v1106_v32 = vpop.f32.mrb[32].mxu1 }
 0x262   :  { %v1732_v33 = vmul.f32 0.35355338, %v1106_v32  ;;  %v1467_v34 = vpop.f32.mrb[33].mxu1 }
 0x263   :  { %v1109_v35 = vpop.f32.mrb[34].mxu1 }
 0x264   :  { %v1468_v37 = vpop.f32.mrb[35].mxu1  ;;  %v1113_v38 = vsel %vm259_vm2, %v1732_v33, -inf }
 0x265   :  { %1114 = vmax.xlane.f32.xlu0 %v1113_v38 }
 0x2c2   :  { %v422_v47 = vpop.xlane.xlu1 %421 }
 0x2c3   :  { %v423_v48 = vsub.f32 %v1707_v55, %v422_v47 }
 0x2c5   :  { %v424_v49 = vmul.f32 1.442695, %v423_v48 }
 0x2c7   :  { %1506 = vpow2.f32 %v424_v49 }
 0x2ca   :  { %v540_v50 = vpop.xlane.xlu0 %539 }
 0x2cb   :  { %v541_v51 = vsub.f32 %v1711_v61, %v540_v50 }
 0x2cd   :  { %v542_v52 = vmul.f32 1.442695, %v541_v51 }
 0x2cf   :  { %1508 = vpow2.f32 %v542_v52 }
 0x2d1   :  { %v1507_v53 = vpop.eup %1506 }
 0x2d2   :  { %v657_v54 = vpop.xlane.xlu0 %656  ;;  %v426_v56 = vsel %vm259_vm2, %v1507_v53, 0.0 }
 0x2d3   :  { %v658_v57 = vsub.f32 %v1715_v4, %v657_v54  ;;  %427 = vadd.xlane.f32.xlu0 %v426_v56 }
 0x2d5   :  { %v659_v58 = vmul.f32 1.442695, %v658_v57 }
 0x2d7   :  { %1510 = vpow2.f32 %v659_v58 }
 0x2d9   :  { %v1748_v59 = vpop.eup %1508 }
 0x2da   :  { %v544_v55 = vsel %vm259_vm2, %v1748_v59, 0.0  ;;  %v772_v62 = vpop.xlane.xlu1 %771 }
 0x2db   :  { %545 = vadd.xlane.f32.xlu1 %v544_v55  ;;  %v773_v5 = vsub.f32 %v1719_v10, %v772_v62 }
 0x2dd   :  { %v774_v8 = vmul.f32 1.442695, %v773_v5 }
 0x2e1   :  { %v1752_v60 = vpop.eup %1510 }
 0x2e2   :  { %v661_v61 = vsel %vm259_vm2, %v1752_v60, 0.0  ;;  %v883_v6 = vpop.xlane.xlu0 %882 }
 0x2e3   :  { %662 = vadd.xlane.f32.xlu0 %v661_v61  ;;  %v884_v7 = vsub.f32 %v1723_v18, %v883_v6 }
 0x2e5   :  { %v885_v12 = vmul.f32 1.442695, %v884_v7 }
 0x2ea   :  { %v999_v63 = vpop.xlane.xlu1 %998 }
 0x2eb   :  { %v1000_v9 = vsub.f32 %v1727_v25, %v999_v63 }
 0x2ec   :  { %550 = vrot.lane.b32.xlu1 %v1739_v45, %s1562_s7 }
 0x2ed   :  { %v1001_v13 = vmul.f32 1.442695, %v1000_v9 }
 0x2ee   :  { %v315_v0 = vpop.xlane.xlu1 %314 }
 0x2ef   :  { %1512 = vrcp.f32 %v315_v0 }
 0x2f0   :  { %667 = vrot.lane.b32.xlu1 %v1739_v45, %s1564_s9  ;;  %1514 = vpow2.f32 %v774_v8 }
 0x2f1   :  { %1516 = vpow2.f32 %v885_v12 }
 0x2f2   :  { %v1115_v11 = vpop.xlane.xlu0 %1114  ;;  %1518 = vpow2.f32 %v1001_v13 }
 0x2f3   :  { %v1116_v14 = vsub.f32 %v1732_v33, %v1115_v11 }
 0x2f5   :  { %v1117_v10 = vmul.f32 1.442695, %v1116_v14 }
 0x2f7   :  { %1520 = vpow2.f32 %v1117_v10 }
 0x2f9   :  { %433 = vrot.lane.b32.xlu0 %v1739_v45, %s1563_s8  ;;  %v1513_v2 = vpop.eup %1512 }
 0x2fa   :  { %v317_v3 = vmul.f32 %v1513_v2, %v1505_v30  ;;  %v1515_v15 = vpop.eup %1514 }
 0x2fb   :  { %v1769_v16 = vpop.eup %1516  ;;  %v776_v17 = vsel %vm259_vm2, %v1515_v15, 0.0 }
 0x2fc   :  { %v318_v4 = vpack.c.bf16 %v317_v3, %v317_v3  ;;  %v1772_v19 = vpop.eup %1518  ;;  %v887_v18 = vsel %vm259_vm2, %v1769_v16, 0.0 }
 0x2fd   :  { %v1003_v20 = vsel %vm259_vm2, %v1772_v19, 0.0 }
 0x2fe   :  { %1388 = vmatmul.mubr.msk.bf16.vlgmr.msra.gmra.mrb[8].mxu0 %vm259_vm2, %v318_v4 }
 0x2ff   :  { %1399 = vmatprep.mubr.msk.bf16.mxu0 %vm1561_vm0, %v1560_v1 }
 0x301   :  { %v1778_v21 = vpop.eup %1520 }
 0x302   :  { %v1119_v22 = vsel %vm259_vm2, %v1778_v21, 0.0 }
 0x314   :  { %777 = vadd.xlane.f32.xlu1 %v776_v17 }
 0x318   :  { %888 = vadd.xlane.f32.xlu1 %v887_v18  ;;  %1004 = vadd.xlane.f32.xlu0 %v1003_v20 }
 0x31c   :  { %1120 = vadd.xlane.f32.xlu1 %v1119_v22 }
 0x32d   :  { %1009 = vrot.lane.b32.xlu1 %v782_v23, %s1562_s7 }
 0x32e   :  { %893 = vrot.lane.b32.xlu0 %v782_v23, %s1563_s8 }
 0x332   :  { %1125 = vrot.lane.b32.xlu0 %v782_v23, %s1564_s9 }
 0x360   :  { %v428_v24 = vpop.xlane.xlu0 %427 }
 0x361   :  { %1522 = vrcp.f32 %v428_v24 }
 0x368   :  { %v546_v25 = vpop.xlane.xlu1 %545 }
 0x369   :  { %1524 = vrcp.f32 %v546_v25 }
 0x36b   :  { %v1523_v26 = vpop.eup %1522 }
 0x36c   :  { %v430_v28 = vmul.f32 %v1523_v26, %v1507_v53  ;;  %v551_v31 = vpop.permute.xlu1 %550  ;;  %v1502_v26 = vld [vmem:[%s1856_s3 + $0x30] sm:$0xff]  }
 0x36d   :  { %v556_v34 = vsel %vm322_vm3, %v551_v31, 0  ;;  %1476 = vmatpush3.bf16.msra.mxu1 %v1502_v26 }
 0x36e   :  { %v431_v32 = vpack.c.bf16 %v430_v28, %v430_v28  ;;  %1477 = vmatprep.subr.bf16.mxu1 %v1560_v1 }
 0x370   :  { %v663_v27 = vpop.xlane.xlu0 %662  ;;  %v668_v36 = vpop.permute.xlu1 %667 }
 0x371   :  { %1526 = vrcp.f32 %v663_v27  ;;  %v673_v39 = vsel %vm322_vm3, %v668_v36, 0  ;;  %v1503_v27 = vld [vmem:[%s1856_s3 + $0x38] sm:$0xff]  }
 0x372   :  { %1478 = vmatpush3.bf16.msra.mxu1 %v1503_v27 }
 0x373   :  { %v1525_v33 = vpop.eup %1524 }
 0x374   :  { %v434_v29 = vpop.permute.xlu0 %433  ;;  %v548_v35 = vmul.f32 %v1525_v33, %v1748_v59 }
 0x375   :  { %v439_v30 = vsel %vm322_vm3, %v434_v29, 0 }
 0x376   :  { %1398 = vmatpush3.bf16.msra.mxu0 %v439_v30  ;;  %v549_v37 = vpack.c.bf16 %v548_v35, %v548_v35 }
 0x377   :  { %1409 = vmatprep.subr.bf16.mxu0 %v1560_v1 }
 0x379   :  { %1400 = vmatmul.mubr.msk.bf16.vlgmr.msra.gmra.mrb[12].mxu0 %vm259_vm2, %v431_v32 }
 0x37a   :  { %1410 = vmatpush3.bf16.msra.mxu0 %v556_v34  ;;  %1411 = vmatprep.mubr.msk.bf16.mxu0 %vm1561_vm0, %v1560_v1 }
 0x37b   :  { %1421 = vmatprep.subr.bf16.mxu0 %v1560_v1  ;;  %v1527_v38 = vpop.eup %1526 }
 0x37c   :  { %v665_v40 = vmul.f32 %v1527_v38, %v1752_v60 }
 0x37e   :  { %v666_v41 = vpack.c.bf16 %v665_v40, %v665_v40 }
 0x381   :  { %1412 = vmatmul.mubr.msk.bf16.vlgmr.msra.gmra.mrb[16].mxu0 %vm259_vm2, %v549_v37 }
 0x382   :  { %1422 = vmatpush3.bf16.msra.mxu0 %v673_v39  ;;  %1423 = vmatprep.mubr.msk.bf16.mxu0 %vm1561_vm0, %v1560_v1 }
 0x383   :  { %1433 = vmatprep.subr.bf16.mxu0 %v1560_v1 }
 0x389   :  { %1424 = vmatmul.mubr.msk.bf16.vlgmr.msra.gmra.mrb[20].mxu0 %vm259_vm2, %v666_v41 }
 0x38a   :  { %1434 = vmatpush3.bf16.msra.mxu0 %v787_v42  ;;  %1435 = vmatprep.mubr.msk.bf16.mxu0 %vm1561_vm0, %v1560_v1 }
 0x38b   :  { %1445 = vmatprep.subr.bf16.mxu0 %v1560_v1 }
 0x3a1   :  { %v778_v43 = vpop.xlane.xlu1 %777 }
 0x3a2   :  { %1528 = vrcp.f32 %v778_v43 }
 0x3a5   :  { %v889_v44 = vpop.xlane.xlu1 %888  ;;  %v1005_v45 = vpop.xlane.xlu0 %1004 }
 0x3a6   :  { %1530 = vrcp.f32 %v889_v44  ;;  %v1307_v44 = vld [vmem:[%s1857_s4 + $0x3] ss:$0 sm:$0xff] }
 0x3a7   :  { %1532 = vrcp.f32 %v1005_v45 }
 0x3a9   :  { %v894_v48 = vpop.permute.xlu0 %893  ;;  %v1121_v51 = vpop.xlane.xlu1 %1120 }
 0x3aa   :  { %v899_v52 = vsel %vm322_vm3, %v894_v48, 0  ;;  %1534 = vrcp.f32 %v1121_v51 }
 0x3ac   :  { %v1529_v46 = vpop.eup %1528 }
 0x3ad   :  { %v780_v47 = vmul.f32 %v1529_v46, %v1515_v15  ;;  %v1010_v54 = vpop.permute.xlu1 %1009  ;;  %v1126_v55 = vpop.permute.xlu0 %1125 }
 0x3ae   :  { %v1015_v58 = vsel %vm322_vm3, %v1010_v54, 0  ;;  %v1131_v62 = vsel %vm322_vm3, %v1126_v55, 0 }
 0x3af   :  { %v781_v49 = vpack.c.bf16 %v780_v47, %v780_v47 }
 0x3b0   :  { %v1531_v50 = vpop.eup %1530 }
 0x3b1   :  { %1436 = vmatmul.mubr.msk.bf16.vlgmr.msra.gmra.mrb[24].mxu0 %vm259_vm2, %v781_v49  ;;  %v891_v53 = vmul.f32 %v1531_v50, %v1769_v16  ;;  %v1533_v57 = vpop.eup %1532 }
 0x3b2   :  { %1446 = vmatpush3.bf16.msra.mxu0 %v899_v52  ;;  %1447 = vmatprep.mubr.msk.bf16.mxu0 %vm1561_vm0, %v1560_v1  ;;  %v1007_v59 = vmul.f32 %v1533_v57, %v1772_v19 }
 0x3b3   :  { %1457 = vmatprep.subr.bf16.mxu0 %v1560_v1  ;;  %v892_v56 = vpack.c.bf16 %v891_v53, %v891_v53 }
 0x3b4   :  { %v1008_v60 = vpack.c.bf16 %v1007_v59, %v1007_v59  ;;  %v1535_v61 = vpop.eup %1534 }
 0x3b5   :  { %v1123_v63 = vmul.f32 %v1535_v61, %v1778_v21 }
 0x3b7   :  { %v1124_v0 = vpack.c.bf16 %v1123_v63, %v1123_v63 }
 0x3b9   :  { %1448 = vmatmul.mubr.msk.bf16.vlgmr.msra.gmra.mrb[28].mxu0 %vm259_vm2, %v892_v56 }
 0x3ba   :  { %1458 = vmatpush3.bf16.msra.mxu0 %v1015_v58  ;;  %1459 = vmatprep.mubr.msk.bf16.mxu0 %vm1561_vm0, %v1560_v1 }
 0x3bb   :  { %1469 = vmatprep.subr.bf16.mxu0 %v1560_v1 }
 0x3c1   :  { %1460 = vmatmul.mubr.msk.bf16.vlgmr.msra.gmra.mrb[32].mxu0 %vm259_vm2, %v1008_v60 }
 0x3c2   :  { %1470 = vmatpush3.bf16.msra.mxu0 %v1131_v62  ;;  %1471 = vmatprep.mubr.msk.bf16.mxu0 %vm1561_vm0, %v1560_v1 }
 0x3c9   :  { %1472 = vmatmul.mubr.msk.bf16.vlgmr.msra.gmra.mrb[36].mxu0 %vm259_vm2, %v1124_v0 }
 0x3d1   :  { %v360_v2 = vpop.f32.mrb[8].mxu0 }
 0x3d2   :  { %366 = vst.msk [vmem:[#allocation2] sm:$0xff] %vm259_vm2, %v360_v2  ;;  %v1389_v3 = vpop.f32.mrb[9].mxu0 }
 0x3d3   :  { %v363_v4 = vpop.f32.mrb[10].mxu0 }
 0x3d4   :  { %v1390_v5 = vpop.f32.mrb[11].mxu0 }
 0x44c   :  { %v475_v6 = vpop.f32.mrb[12].mxu0 }
 0x44d   :  { %482 = vrot.lane.b32.xlu0 %v475_v6, %s1565_s17  ;;  %v1401_v7 = vpop.f32.mrb[13].mxu0 }
 0x44e   :  { %v478_v8 = vpop.f32.mrb[14].mxu0 }
 0x44f   :  { %v1402_v9 = vpop.f32.mrb[15].mxu0 }
 0x454   :  { %v592_v11 = vpop.f32.mrb[16].mxu0 }
 0x455   :  { %599 = vrot.lane.b32.xlu0 %v592_v11, %s1566_s18  ;;  %v1413_v12 = vpop.f32.mrb[17].mxu0 }
 0x456   :  { %v595_v13 = vpop.f32.mrb[18].mxu0 }
 0x457   :  { %v1414_v14 = vpop.f32.mrb[19].mxu0 }
 0x45c   :  { %v709_v10 = vpop.f32.mrb[20].mxu0 }
 0x45d   :  { %716 = vrot.lane.b32.xlu0 %v709_v10, %s1567_s19  ;;  %v1425_v15 = vpop.f32.mrb[21].mxu0 }
 0x45e   :  { %v712_v16 = vpop.f32.mrb[22].mxu0 }
 0x45f   :  { %v1426_v17 = vpop.f32.mrb[23].mxu0 }
 0x484   :  { %v823_v19 = vpop.f32.mrb[24].mxu0 }
 0x485   :  { %829 = vst.msk [vmem:[#allocation2 + $0x8] sm:$0xff] %vm259_vm2, %v823_v19  ;;  %v1437_v18 = vpop.f32.mrb[25].mxu0 }
 0x486   :  { %v826_v20 = vpop.f32.mrb[26].mxu0 }
 0x487   :  { %v1438_v21 = vpop.f32.mrb[27].mxu0 }
 0x48c   :  { %v935_v22 = vpop.f32.mrb[28].mxu0 }
 0x48d   :  { %942 = vrot.lane.b32.xlu1 %v935_v22, %s1565_s17  ;;  %v1449_v23 = vpop.f32.mrb[29].mxu0 }
 0x48e   :  { %v938_v24 = vpop.f32.mrb[30].mxu0 }
 0x48f   :  { %v1450_v25 = vpop.f32.mrb[31].mxu0 }
 0x494   :  { %v1051_v28 = vpop.f32.mrb[32].mxu0 }
 0x495   :  { %1058 = vrot.lane.b32.xlu1 %v1051_v28, %s1566_s18  ;;  %v1461_v29 = vpop.f32.mrb[33].mxu0 }
 0x496   :  { %v1054_v30 = vpop.f32.mrb[34].mxu0 }
 0x497   :  { %v1462_v31 = vpop.f32.mrb[35].mxu0 }
 0x49c   :  { %v1167_v32 = vpop.f32.mrb[36].mxu0 }
 0x49d   :  { %1174 = vrot.lane.b32.xlu1 %v1167_v32, %s1567_s19  ;;  %v1473_v33 = vpop.f32.mrb[37].mxu0 }
 0x49e   :  { %v1170_v34 = vpop.f32.mrb[38].mxu0 }
 0x49f   :  { %v1474_v35 = vpop.f32.mrb[39].mxu0 }
 0x4bf   :  { %v483_v36 = vpop.permute.xlu0 %482 }
 0x4c0   :  { %486 = vst.msk [vmem:[#allocation2] sm:$0xff] %vm485_vm4, %v483_v36 }
 0x4c7   :  { %v600_v37 = vpop.permute.xlu0 %599 }
 0x4c8   :  { %603 = vst.msk [vmem:[#allocation2] sm:$0xff] %vm602_vm5, %v600_v37 }
 0x4cf   :  { %v717_v38 = vpop.permute.xlu0 %716 }
 0x4d0   :  { %720 = vst.msk [vmem:[#allocation2] sm:$0xff] %vm719_vm6, %v717_v38 }
 0x4d7   :  { %v1178_v41 = vld [vmem:[#allocation2] sm:$0xff] }
 0x4ff   :  { %v943_v1 = vpop.permute.xlu1 %942 }
 0x500   :  { %945 = vst.msk [vmem:[#allocation2 + $0x8] sm:$0xff] %vm485_vm4, %v943_v1 }
 0x507   :  { %v1059_v39 = vpop.permute.xlu1 %1058 }
 0x508   :  { %1061 = vst.msk [vmem:[#allocation2 + $0x8] sm:$0xff] %vm602_vm5, %v1059_v39 }
 0x50f   :  { %v1175_v40 = vpop.permute.xlu1 %1174 }
 0x510   :  { %1177 = vst.msk [vmem:[#allocation2 + $0x8] sm:$0xff] %vm719_vm6, %v1175_v40 }
 0x517   :  { %v1179_v42 = vld [vmem:[#allocation2 + $0x8] sm:$0xff] }
 0x518   :  { %v1180_v43 = vpack.c.bf16 %v1179_v42, %v1178_v41 }
 0x51a   :  { %1480 = vmatmul.mubr.msk.bf16.vlgmr.msra.gmra.mrb[36].mxu1 %vm73_vm1, %v1180_v43 }
 0x5ed   :  { %v1236_v45 = vpop.f32.mrb[36].mxu1 }
 0x5ee   :  { %v1237_v46 = vadd.f32 %v1307_v44, %v1236_v45  ;;  %v1481_v47 = vpop.f32.mrb[37].mxu1 }
 0x5ef   :  { %v1239_v48 = vpop.f32.mrb[38].mxu1 }
 0x5f0   :  { %1243 = vst.msk [vmem:[#allocation3] sm:$0xff] %vm73_vm1, %v1237_v46  ;;  %v1240_v49 = vadd.f32 %v1307_v44, %v1239_v48  ;;  %v1482_v50 = vpop.f32.mrb[39].mxu1 }
 0x5f2   :  { %1244 = vst.msk [vmem:[#allocation3 + $0x8] sm:$0xff] %vm73_vm1, %v1240_v49 }
 0x5f3   :  { %1547 = shalt.err (!%p1544_p4)
}
 0x5f4   :  { %s1548_s29 = scalar_lea.hbm %s1858_s5, 256 }
 0x5f5   :  { %p1549_p5 = scmp.ne.s32.totalorder %s1858_s5, %s1548_s29  ;;  %p1552_p6 = scmp.lt.u32.totalorder %s1548_s29, %s1858_s5 }
 0x5f7   :  { %p1554_p7 = pnand %p1552_p6, %p1549_p5 }
 0x5f9   :  { %1557 = shalt.err (!%p1554_p7)
}
 0x5fa   :  { %s1569_s7 = smov 128  }
 0x5fb   :  { %1256 = dma.vmem_to_hbm [thread:$0]  %s1251_s26, 256, %s1858_s5, [#allocation4], %s1569_s7, %s1569_s7, %s1565_s17  }
 0x5fc   :  { %1558 = dma.done.wait [#allocation4], 256  }
 0x5fd   :  { %1559 = vsyncadd [#allocation4], 4294967040 }
 0x5fe   :  { %1260 = vsyncpa [#allocation4], 1 }

</bundles_post_ra>
